<compile_context>
chip_gen: v5e
topology: v5e:2x2
jax: 0.10.0
libtpu: 0.0.40
codegen_flags: <defaults>
</compile_context>

<pallas_src>
import functools
import math

import jax
import jax.numpy as jnp
from jax import lax
from jax.experimental import pallas as pl
from jax.experimental.pallas import tpu as pltpu


# ----------------------------------------------------------------------------
# Pallas kernel: streamed pooled weighted moment statistics.
# Grid = (n_row_blocks, n_tiles); the tile axis (last) is the spatial reduction.
# ----------------------------------------------------------------------------
def _pooled_stats_kernel(w_ref, x_ref, o_ref, acc_ref, shift_ref, *,
                         hw, tile, n_tiles, needs_mask):
    # w_ref     : SMEM (4,)  f32   [w_mean, w_var, w_skew, w_kurt] (already * level wt)
    # x_ref     : VMEM (R, T)      lane-dense tile of the flattened band (rows = N*C fold)
    # o_ref     : VMEM (R, 4)      weighted (mean, variance, skew, kurtosis) per row
    # acc_ref   : VMEM (4, R, 1)   f32 running shifted power sums S1..S4 (tiny)
    # shift_ref : VMEM (R, 1) f32  per-row shift (first tile's mean)
    k = pl.program_id(1)
    x = x_ref[...].astype(jnp.float32)                     # (R, T)
    R, T = x.shape

    @pl.when(k == 0)
    def _init():
        if needs_mask and n_tiles == 1:
            pos = lax.broadcasted_iota(jnp.int32, (R, T), 1)
            x0 = jnp.where(pos < hw, x, 0.0)
            cnt = float(hw)
        else:
            # First tile is always full when n_tiles > 1 (tile <= hw).
            x0 = x
            cnt = float(tile)
        # Shift = mean of the first tile (protects m3/m4 from cancellation).
        shift_ref[...] = jnp.sum(x0, axis=-1, keepdims=True) * (1.0 / cnt)
        acc_ref[...] = jnp.zeros_like(acc_ref)

    def _accumulate(valid):
        # Pure VPU element-wise work on the tile + 4 lane reductions (XLU slot);
        # the accumulator RMW touches only (R, 1) vectors.
        d = x - shift_ref[...]                              # (R, T)
        if valid is not None:
            d = jnp.where(valid, d, 0.0)                    # padded tail contributes 0
        d2 = d * d
        acc_ref[0] += jnp.sum(d, axis=-1, keepdims=True)
        acc_ref[1] += jnp.sum(d2, axis=-1, keepdims=True)
        acc_ref[2] += jnp.sum(d2 * d, axis=-1, keepdims=True)
        acc_ref[3] += jnp.sum(d2 * d2, axis=-1, keepdims=True)

    if needs_mask:
        last = n_tiles - 1

        @pl.when(k < last)
        def _full_tiles():
            _accumulate(None)                               # no iota/where on full tiles

        @pl.when(k == last)
        def _tail_tile():
            pos = last * tile + lax.broadcasted_iota(jnp.int32, (R, T), 1)
            _accumulate(pos < hw)
    else:
        _accumulate(None)

    @pl.when(k == n_tiles - 1)
    def _finalize():
        inv_n = 1.0 / float(hw)
        a1 = acc_ref[0] * inv_n                             # E[(x-c)]
        a2 = acc_ref[1] * inv_n                             # E[(x-c)^2]
        a3 = acc_ref[2] * inv_n                             # E[(x-c)^3]
        a4 = acc_ref[3] * inv_n                             # E[(x-c)^4]

        mean = shift_ref[...] + a1
        var = a2 - a1 * a1
        m3 = a3 - (3.0 * a2 - 2.0 * a1 * a1) * a1
        m4 = a4 - (4.0 * a3 - (6.0 * a2 - 3.0 * a1 * a1) * a1) * a1

        # Exact reciprocals; epilogue runs once per row block.
        inv_var = pl.reciprocal(var, approx=False)
        inv_sd = pl.reciprocal(jnp.sqrt(var), approx=False)
        skew = m3 * inv_var * inv_sd                        # m3 / sigma^3
        kurt = m4 * inv_var * inv_var                       # m4 / sigma^4 (raw kurtosis)

        out = jnp.concatenate(
            [w_ref[0] * mean, w_ref[1] * var, w_ref[2] * skew, w_ref[3] * kurt],
            axis=-1,
        )                                                   # (R, 4)
        o_ref[...] = out.astype(o_ref.dtype)


# ----------------------------------------------------------------------------
# Wrapper: tiling heuristics + pallas_call.
# ----------------------------------------------------------------------------
def _vmem_capacity_bytes():
    try:
        info = pltpu.get_tpu_info()
        cap = getattr(info, "vmem_capacity_bytes", None)
        if cap:
            return int(cap)
    except Exception:
        pass
    return 64 << 20  # conservative: v7x per-TensorCore VMEM


def _choose_tiling(rows, hw, itemsize, vmem_cap):
    """Pick (row_block, n_row_blocks, tile, n_tiles) for a (rows, hw) band."""
    sub = 8 if itemsize >= 4 else 16                # sublane packing f32 vs bf16
    # Per-step input target: big enough to amortize ~0.35us/step, small enough
    # to double-buffer comfortably on 64 MiB (v7x) as well as 128 MiB parts.
    target = max(min(4 << 20, vmem_cap // 8), 1 << 19)

    rows_small = min(rows, sub)
    if hw <= 128 or hw * itemsize * rows_small <= target:
        tile = hw                                   # full spatial extent, no tail mask
    else:
        cap_lanes = max(128, target // (sub * itemsize))
        tile = min((hw // 128) * 128, (cap_lanes // 128) * 128)
        tile = max(tile, 128)
    n_tiles = -(-hw // tile)

    if rows <= sub:
        rblk = rows                                 # block equals full row extent
    else:
        want_rows = max(sub, target // max(tile * itemsize, 1))
        rblk = min((rows // sub) * sub, (want_rows // sub) * sub)
        rblk = max(min(rblk, 1024), sub)
    n_rblk = -(-rows // rblk)
    return rblk, n_rblk, tile, n_tiles


def pooled_weighted_statistics(x, weights4):
    """x: (N, C, H, W) float; weights4: (4,) f32. Returns (N, C, 4) f32."""
    N, C, H, W = x.shape
    rows = N * C
    hw = H * W
    xf = x.reshape(rows, hw)                        # free reshape for contiguous NCHW
    itemsize = jnp.dtype(xf.dtype).itemsize
    weights4 = jnp.asarray(weights4, jnp.float32)

    vmem_cap = _vmem_capacity_bytes()
    rblk, n_rblk, tile, n_tiles = _choose_tiling(rows, hw, itemsize, vmem_cap)
    needs_mask = (hw % tile) != 0

    # VMEM limit derived from the actual footprint (input double-buffered,
    # scratch single, output tiny), with generous margin, capped per-chip.
    pad8 = lambda v: -(-v // 8) * 8
    pad128 = lambda v: -(-v // 128) * 128
    in_bytes = 2 * pad8(rblk) * pad128(tile) * itemsize
    out_bytes = 2 * pad8(rblk) * 128 * 4
    scr_bytes = 5 * pad8(rblk) * 128 * 4
    footprint = in_bytes + out_bytes + scr_bytes
    vmem_limit = int(min(max(2 * footprint + (2 << 20), 8 << 20),
                         int(vmem_cap * 0.9)))

    kernel = functools.partial(_pooled_stats_kernel, hw=hw, tile=tile,
                               n_tiles=n_tiles, needs_mask=needs_mask)
    out = pl.pallas_call(
        kernel,
        out_shape=jax.ShapeDtypeStruct((rows, 4), jnp.float32),
        grid=(n_rblk, n_tiles),
        in_specs=[
            pl.BlockSpec(memory_space=pltpu.MemorySpace.SMEM),      # weights (4,)
            pl.BlockSpec((rblk, tile), lambda i, k: (i, k)),        # band tile
        ],
        out_specs=pl.BlockSpec((rblk, 4), lambda i, k: (i, 0)),     # resident over k
        scratch_shapes=[
            pltpu.VMEM((4, rblk, 1), jnp.float32),                  # S1..S4 accumulators
            pltpu.VMEM((rblk, 1), jnp.float32),                     # per-row shift
        ],
        compiler_params=pltpu.CompilerParams(
            dimension_semantics=("parallel", "arbitrary"),
            vmem_limit_bytes=vmem_limit,
        ),
    )(weights4, xf)
    return out.reshape(N, C, 4)


# ----------------------------------------------------------------------------
# JAX mirror of the MetamerStatistics module (config lives on host).
# ----------------------------------------------------------------------------
class MetamerStatistics:
    def __init__(self):
        self.per_level_weight = math.sqrt(2)
        self._all_stats_list = None
        self.named_stat_groups = {}
        self.category_weights = {
            'mean': 2, 'variance': 1, 'skew': 1, 'kurtosis': 1,
            'bandpass_variance': 40, 'autocorrelation': 0.5,
            'edge_mean': 10, 'edge_variance': 80, 'edge_kurtosis': 800,
            'edge_autocorrelation': 2, 'edge_correlation': 80,
            'edge_stop': 100, 'edge_continue': 80, 'phase_correlation': 400,
            'covariance': 1, 'edge_covariance': 80, 'phase_covariance': 400,
        }

    def set_mode(self, mode, value):
        if hasattr(self, mode):
            setattr(self, mode, value)
        elif mode in self.category_weights:
            self.category_weights[mode] = value
        else:
            raise NameError(f'Attribute or weight: {mode}  does not exist or is misspelled')

    def set_stat(self, attr, value, error_if_missing=True):
        attr = 'stat_' + attr
        if hasattr(self, attr):
            setattr(self, attr, value)
            return True
        if error_if_missing:
            raise NameError(f'Attribute: {attr}  does not exist or is misspelled')
        return False

    def set_all_stats(self, boolean):
        for s in self.get_list_of_stats():
            self.set_stat(s, boolean)

    def get_stat(self, attr):
        attr = 'stat_' + attr
        if hasattr(self, attr):
            return getattr(self, attr)
        raise NameError(f'Attribute: {attr}  does not exist or is misspelled')

    def get_list_of_stats(self):
        if self._all_stats_list is None:
            self._all_stats_list = [a[5:] for a in self.__dict__ if a.startswith('stat_')]
        return self._all_stats_list

    def set_stat_group(self, groupname, value):
        if groupname not in self.named_stat_groups:
            return False
        for stat in self.named_stat_groups[groupname]:
            if stat in self.named_stat_groups:
                self.set_stat_group(stat, value)
            else:
                self.set_stat(stat, value)
        return True

    def set_per_level_weight_multiplier(self, value):
        self.per_level_weight = value

    def _level_weight(self, level):
        if level is None:
            return 1.0
        if hasattr(level, '__iter__'):
            level = max(level)
        return self.per_level_weight ** level

    def pooled_moment_statistics(self, x, level=None):
        """Pallas hot path: weighted pooled (mean, var, skew, kurtosis)."""
        lw = float(self._level_weight(level))
        w = jnp.asarray(
            [
                self.category_weights['mean'],
                self.category_weights['variance'],
                self.category_weights['skew'],
                self.category_weights['kurtosis'],
            ],
            dtype=jnp.float32,
        ) * jnp.float32(lw)
        return pooled_weighted_statistics(x, w)

    def forward(self, spyr, poolfunc, stat_labels=None, statlabel_callback=None):
        # TODO(synk): the base class forward is abstract (NotImplementedError);
        # concrete steerable-pyramid / edge / phase statistics live in subclasses.
        raise NotImplementedError('Subclasses must implement this method')


# ----------------------------------------------------------------------------
# Pure-JAX reference (for correctness check only).
# ----------------------------------------------------------------------------
def _reference(x, weights4):
    xf = x.astype(jnp.float32)
    mean = jnp.mean(xf, axis=(2, 3))
    d = xf - mean[:, :, None, None]
    var = jnp.mean(d * d, axis=(2, 3))
    m3 = jnp.mean(d ** 3, axis=(2, 3))
    m4 = jnp.mean(d ** 4, axis=(2, 3))
    skew = m3 / (var * jnp.sqrt(var))
    kurt = m4 / (var * var)
    stats = jnp.stack([mean, var, skew, kurt], axis=-1)
    return stats * weights4[None, None, :]


if __name__ == "__main__":
    key = jax.random.PRNGKey(0)
    x = jax.random.normal(key, (2, 4, 16, 16), dtype=jnp.float32)

    mod = MetamerStatistics()
    level = 1  # weighted by per_level_weight**1 = sqrt(2)

    out = mod.pooled_moment_statistics(x, level=level)
    out = jax.block_until_ready(out)

    lw = jnp.float32(mod._level_weight(level))
    w = jnp.asarray(
        [mod.category_weights['mean'], mod.category_weights['variance'],
         mod.category_weights['skew'], mod.category_weights['kurtosis']],
        dtype=jnp.float32) * lw
    ref = _reference(x, w)

    assert out.shape == (2, 4, 4)
    assert jnp.allclose(out, ref, rtol=1e-4, atol=1e-4), float(jnp.max(jnp.abs(out - ref)))
    print("KERNEL_OK")
</pallas_src>

<mosaic_0001>
module attributes {stable_mosaic.version = 11 : i64} {
  func.func @_pooled_stats_kernel(%arg0: i32, %arg1: i32, %arg2: memref<4xf32, #tpu.memory_space<smem>>, %arg3: memref<8x256xf32, #tpu.memory_space<vmem>>, %arg4: memref<8x4xf32, #tpu.memory_space<vmem>>, %arg5: memref<4x8x1xf32, #tpu.memory_space<vmem>>, %arg6: memref<8x1xf32, #tpu.memory_space<vmem>>) attributes {dimension_semantics = [#tpu.dimension_semantics<parallel>, #tpu.dimension_semantics<arbitrary>], iteration_bounds = array<i64: 1, 1>, scalar_prefetch = 0 : i64, scratch_operands = 2 : i64, tpu.core_type = #tpu.core_type<tc>, window_params = [{transform_indices = @transform_0, window_bounds = array<i64: 4>}, {transform_indices = @transform_1, window_bounds = array<i64: 8, 256>}, {transform_indices = @transform_2, window_bounds = array<i64: 8, 4>}]} {
    %c0 = arith.constant 0 : index
    %c0_0 = arith.constant 0 : index
    %0 = vector.load %arg3[%c0, %c0_0] : memref<8x256xf32, #tpu.memory_space<vmem>>, vector<8x256xf32>
    %c0_i32 = arith.constant 0 : i32
    %1 = arith.cmpi eq, %arg1, %c0_i32 : i32
    %2 = arith.extui %1 : i1 to i32
    %c0_i32_1 = arith.constant 0 : i32
    %3 = arith.cmpi ne, %2, %c0_i32_1 : i32
    scf.if %3 {
      %cst_30 = arith.constant dense<0.000000e+00> : vector<8xf32>
      %45 = vector.multi_reduction <add>, %0, %cst_30 [1] : vector<8x256xf32> to vector<8xf32>
      %46 = vector.shape_cast %45 : vector<8xf32> to vector<8x1xf32>
      %cst_31 = arith.constant 3.906250e-03 : f32
      %47 = vector.broadcast %cst_31 : f32 to vector<8x1xf32>
      %48 = arith.mulf %46, %47 : vector<8x1xf32>
      %c0_32 = arith.constant 0 : index
      %c0_33 = arith.constant 0 : index
      %49 = vector.load %arg6[%c0_32, %c0_33] : memref<8x1xf32, #tpu.memory_space<vmem>>, vector<8x1xf32>
      tpu.vector_store %arg6[%c0_32, %c0_33], %48 {strides = array<i32>} : memref<8x1xf32, #tpu.memory_space<vmem>>, vector<8x1xf32>,
      %cst_34 = arith.constant 0.000000e+00 : f32
      %50 = vector.broadcast %cst_34 : f32 to vector<4x8x1xf32>
      %c0_35 = arith.constant 0 : index
      %c0_36 = arith.constant 0 : index
      %c0_37 = arith.constant 0 : index
      %51 = vector.load %arg5[%c0_35, %c0_36, %c0_37] : memref<4x8x1xf32, #tpu.memory_space<vmem>>, vector<4x8x1xf32>
      tpu.vector_store %arg5[%c0_35, %c0_36, %c0_37], %50 {strides = array<i32>} : memref<4x8x1xf32, #tpu.memory_space<vmem>>, vector<4x8x1xf32>,
    } else {
    }
    %c0_2 = arith.constant 0 : index
    %c0_3 = arith.constant 0 : index
    %4 = vector.load %arg6[%c0_2, %c0_3] : memref<8x1xf32, #tpu.memory_space<vmem>>, vector<8x1xf32>
    %5 = vector.broadcast %4 : vector<8x1xf32> to vector<8x256xf32>
    %6 = arith.subf %0, %5 : vector<8x256xf32>
    %7 = arith.mulf %6, %6 : vector<8x256xf32>
    %c0_4 = arith.constant 0 : index
    %c0_5 = arith.constant 0 : index
    %c0_6 = arith.constant 0 : index
    %8 = vector.load %arg5[%c0_4, %c0_5, %c0_6] : memref<4x8x1xf32, #tpu.memory_space<vmem>>, vector<1x8x1xf32>
    %9 = vector.shape_cast %8 : vector<1x8x1xf32> to vector<8x1xf32>
    %cst = arith.constant dense<0.000000e+00> : vector<8xf32>
    %10 = vector.multi_reduction <add>, %6, %cst [1] : vector<8x256xf32> to vector<8xf32>
    %11 = vector.shape_cast %10 : vector<8xf32> to vector<8x1xf32>
    %12 = arith.addf %9, %11 : vector<8x1xf32>
    %c0_7 = arith.constant 0 : index
    %c0_8 = arith.constant 0 : index
    %c0_9 = arith.constant 0 : index
    %13 = vector.load %arg5[%c0_7, %c0_8, %c0_9] : memref<4x8x1xf32, #tpu.memory_space<vmem>>, vector<1x8x1xf32>
    %14 = vector.shape_cast %13 : vector<1x8x1xf32> to vector<8x1xf32>
    %15 = vector.shape_cast %12 : vector<8x1xf32> to vector<1x8x1xf32>
    tpu.vector_store %arg5[%c0_7, %c0_8, %c0_9], %15 {strides = array<i32>} : memref<4x8x1xf32, #tpu.memory_space<vmem>>, vector<1x8x1xf32>,
    %c1 = arith.constant 1 : index
    %c0_10 = arith.constant 0 : index
    %c0_11 = arith.constant 0 : index
    %16 = vector.load %arg5[%c1, %c0_10, %c0_11] : memref<4x8x1xf32, #tpu.memory_space<vmem>>, vector<1x8x1xf32>
    %17 = vector.shape_cast %16 : vector<1x8x1xf32> to vector<8x1xf32>
    %cst_12 = arith.constant dense<0.000000e+00> : vector<8xf32>
    %18 = vector.multi_reduction <add>, %7, %cst_12 [1] : vector<8x256xf32> to vector<8xf32>
    %19 = vector.shape_cast %18 : vector<8xf32> to vector<8x1xf32>
    %20 = arith.addf %17, %19 : vector<8x1xf32>
    %c1_13 = arith.constant 1 : index
    %c0_14 = arith.constant 0 : index
    %c0_15 = arith.constant 0 : index
    %21 = vector.load %arg5[%c1_13, %c0_14, %c0_15] : memref<4x8x1xf32, #tpu.memory_space<vmem>>, vector<1x8x1xf32>
    %22 = vector.shape_cast %21 : vector<1x8x1xf32> to vector<8x1xf32>
    %23 = vector.shape_cast %20 : vector<8x1xf32> to vector<1x8x1xf32>
    tpu.vector_store %arg5[%c1_13, %c0_14, %c0_15], %23 {strides = array<i32>} : memref<4x8x1xf32, #tpu.memory_space<vmem>>, vector<1x8x1xf32>,
    %c2 = arith.constant 2 : index
    %c0_16 = arith.constant 0 : index
    %c0_17 = arith.constant 0 : index
    %24 = vector.load %arg5[%c2, %c0_16, %c0_17] : memref<4x8x1xf32, #tpu.memory_space<vmem>>, vector<1x8x1xf32>
    %25 = vector.shape_cast %24 : vector<1x8x1xf32> to vector<8x1xf32>
    %26 = arith.mulf %7, %6 : vector<8x256xf32>
    %cst_18 = arith.constant dense<0.000000e+00> : vector<8xf32>
    %27 = vector.multi_reduction <add>, %26, %cst_18 [1] : vector<8x256xf32> to vector<8xf32>
    %28 = vector.shape_cast %27 : vector<8xf32> to vector<8x1xf32>
    %29 = arith.addf %25, %28 : vector<8x1xf32>
    %c2_19 = arith.constant 2 : index
    %c0_20 = arith.constant 0 : index
    %c0_21 = arith.constant 0 : index
    %30 = vector.load %arg5[%c2_19, %c0_20, %c0_21] : memref<4x8x1xf32, #tpu.memory_space<vmem>>, vector<1x8x1xf32>
    %31 = vector.shape_cast %30 : vector<1x8x1xf32> to vector<8x1xf32>
    %32 = vector.shape_cast %29 : vector<8x1xf32> to vector<1x8x1xf32>
    tpu.vector_store %arg5[%c2_19, %c0_20, %c0_21], %32 {strides = array<i32>} : memref<4x8x1xf32, #tpu.memory_space<vmem>>, vector<1x8x1xf32>,
    %c3 = arith.constant 3 : index
    %c0_22 = arith.constant 0 : index
    %c0_23 = arith.constant 0 : index
    %33 = vector.load %arg5[%c3, %c0_22, %c0_23] : memref<4x8x1xf32, #tpu.memory_space<vmem>>, vector<1x8x1xf32>
    %34 = vector.shape_cast %33 : vector<1x8x1xf32> to vector<8x1xf32>
    %35 = arith.mulf %7, %7 : vector<8x256xf32>
    %cst_24 = arith.constant dense<0.000000e+00> : vector<8xf32>
    %36 = vector.multi_reduction <add>, %35, %cst_24 [1] : vector<8x256xf32> to vector<8xf32>
    %37 = vector.shape_cast %36 : vector<8xf32> to vector<8x1xf32>
    %38 = arith.addf %34, %37 : vector<8x1xf32>
    %c3_25 = arith.constant 3 : index
    %c0_26 = arith.constant 0 : index
    %c0_27 = arith.constant 0 : index
    %39 = vector.load %arg5[%c3_25, %c0_26, %c0_27] : memref<4x8x1xf32, #tpu.memory_space<vmem>>, vector<1x8x1xf32>
    %40 = vector.shape_cast %39 : vector<1x8x1xf32> to vector<8x1xf32>
    %41 = vector.shape_cast %38 : vector<8x1xf32> to vector<1x8x1xf32>
    tpu.vector_store %arg5[%c3_25, %c0_26, %c0_27], %41 {strides = array<i32>} : memref<4x8x1xf32, #tpu.memory_space<vmem>>, vector<1x8x1xf32>,
    %c0_i32_28 = arith.constant 0 : i32
    %42 = arith.cmpi eq, %arg1, %c0_i32_28 : i32
    %43 = arith.extui %42 : i1 to i32
    %c0_i32_29 = arith.constant 0 : i32
    %44 = arith.cmpi ne, %43, %c0_i32_29 : i32
    scf.if %44 {
      %c0_30 = arith.constant 0 : index
      %c0_31 = arith.constant 0 : index
      %c0_32 = arith.constant 0 : index
      %45 = vector.load %arg5[%c0_30, %c0_31, %c0_32] : memref<4x8x1xf32, #tpu.memory_space<vmem>>, vector<1x8x1xf32>
      %46 = vector.shape_cast %45 : vector<1x8x1xf32> to vector<8x1xf32>
      %cst_33 = arith.constant 3.906250e-03 : f32
      %47 = vector.broadcast %cst_33 : f32 to vector<8x1xf32>
      %48 = arith.mulf %46, %47 : vector<8x1xf32>
      %c1_34 = arith.constant 1 : index
      %c0_35 = arith.constant 0 : index
      %c0_36 = arith.constant 0 : index
      %49 = vector.load %arg5[%c1_34, %c0_35, %c0_36] : memref<4x8x1xf32, #tpu.memory_space<vmem>>, vector<1x8x1xf32>
      %50 = vector.shape_cast %49 : vector<1x8x1xf32> to vector<8x1xf32>
      %cst_37 = arith.constant 3.906250e-03 : f32
      %51 = vector.broadcast %cst_37 : f32 to vector<8x1xf32>
      %52 = arith.mulf %50, %51 : vector<8x1xf32>
      %c2_38 = arith.constant 2 : index
      %c0_39 = arith.constant 0 : index
      %c0_40 = arith.constant 0 : index
      %53 = vector.load %arg5[%c2_38, %c0_39, %c0_40] : memref<4x8x1xf32, #tpu.memory_space<vmem>>, vector<1x8x1xf32>
      %54 = vector.shape_cast %53 : vector<1x8x1xf32> to vector<8x1xf32>
      %cst_41 = arith.constant 3.906250e-03 : f32
      %55 = vector.broadcast %cst_41 : f32 to vector<8x1xf32>
      %56 = arith.mulf %54, %55 : vector<8x1xf32>
      %c3_42 = arith.constant 3 : index
      %c0_43 = arith.constant 0 : index
      %c0_44 = arith.constant 0 : index
      %57 = vector.load %arg5[%c3_42, %c0_43, %c0_44] : memref<4x8x1xf32, #tpu.memory_space<vmem>>, vector<1x8x1xf32>
      %58 = vector.shape_cast %57 : vector<1x8x1xf32> to vector<8x1xf32>
      %cst_45 = arith.constant 3.906250e-03 : f32
      %59 = vector.broadcast %cst_45 : f32 to vector<8x1xf32>
      %60 = arith.mulf %58, %59 : vector<8x1xf32>
      %c0_46 = arith.constant 0 : index
      %c0_47 = arith.constant 0 : index
      %61 = vector.load %arg6[%c0_46, %c0_47] : memref<8x1xf32, #tpu.memory_space<vmem>>, vector<8x1xf32>
      %62 = arith.addf %61, %48 : vector<8x1xf32>
      %63 = arith.mulf %48, %48 : vector<8x1xf32>
      %64 = arith.subf %52, %63 : vector<8x1xf32>
      %cst_48 = arith.constant 3.000000e+00 : f32
      %65 = vector.broadcast %cst_48 : f32 to vector<8x1xf32>
      %66 = arith.mulf %65, %52 : vector<8x1xf32>
      %cst_49 = arith.constant 2.000000e+00 : f32
      %67 = vector.broadcast %cst_49 : f32 to vector<8x1xf32>
      %68 = arith.mulf %67, %48 : vector<8x1xf32>
      %69 = arith.mulf %68, %48 : vector<8x1xf32>
      %70 = arith.subf %66, %69 : vector<8x1xf32>
      %71 = arith.mulf %70, %48 : vector<8x1xf32>
      %72 = arith.subf %56, %71 : vector<8x1xf32>
      %cst_50 = arith.constant 4.000000e+00 : f32
      %73 = vector.broadcast %cst_50 : f32 to vector<8x1xf32>
      %74 = arith.mulf %73, %56 : vector<8x1xf32>
      %cst_51 = arith.constant 6.000000e+00 : f32
      %75 = vector.broadcast %cst_51 : f32 to vector<8x1xf32>
      %76 = arith.mulf %75, %52 : vector<8x1xf32>
      %cst_52 = arith.constant 3.000000e+00 : f32
      %77 = vector.broadcast %cst_52 : f32 to vector<8x1xf32>
      %78 = arith.mulf %77, %48 : vector<8x1xf32>
      %79 = arith.mulf %78, %48 : vector<8x1xf32>
      %80 = arith.subf %76, %79 : vector<8x1xf32>
      %81 = arith.mulf %80, %48 : vector<8x1xf32>
      %82 = arith.subf %74, %81 : vector<8x1xf32>
      %83 = arith.mulf %82, %48 : vector<8x1xf32>
      %84 = arith.subf %60, %83 : vector<8x1xf32>
      %85 = tpu.reciprocal %64 : vector<8x1xf32> -> vector<8x1xf32>
      %86 = math.sqrt %64 : vector<8x1xf32>
      %87 = tpu.reciprocal %86 : vector<8x1xf32> -> vector<8x1xf32>
      %88 = arith.mulf %72, %85 : vector<8x1xf32>
      %89 = arith.mulf %88, %87 : vector<8x1xf32>
      %90 = arith.mulf %84, %85 : vector<8x1xf32>
      %91 = arith.mulf %90, %85 : vector<8x1xf32>
      %c0_53 = arith.constant 0 : index
      %92 = memref.load %arg2[%c0_53] : memref<4xf32, #tpu.memory_space<smem>>
      %93 = vector.broadcast %92 : f32 to vector<8x1xf32>
      %94 = arith.mulf %93, %62 : vector<8x1xf32>
      %c1_54 = arith.constant 1 : index
      %95 = memref.load %arg2[%c1_54] : memref<4xf32, #tpu.memory_space<smem>>
      %96 = vector.broadcast %95 : f32 to vector<8x1xf32>
      %97 = arith.mulf %96, %64 : vector<8x1xf32>
      %c2_55 = arith.constant 2 : index
      %98 = memref.load %arg2[%c2_55] : memref<4xf32, #tpu.memory_space<smem>>
      %99 = vector.broadcast %98 : f32 to vector<8x1xf32>
      %100 = arith.mulf %99, %89 : vector<8x1xf32>
      %c3_56 = arith.constant 3 : index
      %101 = memref.load %arg2[%c3_56] : memref<4xf32, #tpu.memory_space<smem>>
      %102 = vector.broadcast %101 : f32 to vector<8x1xf32>
      %103 = arith.mulf %102, %91 : vector<8x1xf32>
      %104 = tpu.concatenate %94, %97, %100, %103 in 1 : vector<8x1xf32>, vector<8x1xf32>, vector<8x1xf32>, vector<8x1xf32> -> vector<8x4xf32>
      %c0_57 = arith.constant 0 : index
      %c0_58 = arith.constant 0 : index
      %105 = vector.load %arg4[%c0_57, %c0_58] : memref<8x4xf32, #tpu.memory_space<vmem>>, vector<8x4xf32>
      tpu.vector_store %arg4[%c0_57, %c0_58], %104 {strides = array<i32>} : memref<8x4xf32, #tpu.memory_space<vmem>>, vector<8x4xf32>,
    } else {
    }
    return
  }
  func.func @transform_0(%arg0: i32, %arg1: i32) -> i32 {
    %c0_i32 = arith.constant 0 : i32
    %c0_i32_0 = arith.constant 0 : i32
    return %c0_i32 : i32
  }
  func.func @transform_1(%arg0: i32, %arg1: i32) -> (i32, i32) {
    %c0_i32 = arith.constant 0 : i32
    return %arg0, %arg1 : i32, i32
  }
  func.func @transform_2(%arg0: i32, %arg1: i32) -> (i32, i32) {
    %c0_i32 = arith.constant 0 : i32
    %c0_i32_0 = arith.constant 0 : i32
    return %arg0, %c0_i32 : i32, i32
  }
}

</mosaic_0001>

<bundles_post_ra>
// kernel: tpu_custom_call.1
= control target key start
LH: loop header
LB: loop body
LE: loop exit
PB: predicated region body
PF: predicated region fallthrough
CT: control target
= control target key end

     0   :  { %7 = vsyncpa [#allocation6], 0  ;;  %s321_s0 = inlined_call_operand.hbm [shape: f32[4], index: 0, kind: input, shape index: {}]   ;;  %s322_s1 = inlined_call_operand.hbm [shape: f32[8,256], index: 1, kind: input, shape index: {}]   ;;  %s323_s2 = inlined_call_operand.vmem [shape: f32[8,4], index: 2, kind: output, shape index: {}]  }
   0x1   :  { %s14_s11 = sshll.u32 %s321_s0, 4  ;;  %s15_s11 = int_to_ptr.hbm [resolvable:$true] %s14_s11 }
   0x2   :  { %8 = vsyncpa [#allocation5], 0  ;;  %s23_s14 = sshll.u32 %s322_s1, 4  ;;  %s264_s15 = smov [#allocation4]   ;;  %s24_s14 = int_to_ptr.hbm [resolvable:$true] %s23_s14 }
   0x3   :  { %17 = dma.hbm_to_smem %s15_s11, 16, %s264_s15, [#allocation6]  }
   0x4   :  { %s265_s16 = smov [#allocation7]  }
   0x5   :  { %s25_s17 = sshll.u32 %s265_s16, 4  ;;  %s26_s17 = int_to_ptr.vmem [resolvable:$true] %s25_s17 }
   0x6   :  { %28 = dma.hbm_to_vmem [thread:$0]  %s24_s14, 256, %s26_s17, [#allocation5]  }
   0x7   :  { %260 = dma.done.wait [#allocation6], 16  }
   0x8   :  { %261 = vsyncadd [#allocation6], 4294967280 }
   0x9   :  { %262 = dma.done.wait [#allocation5], 256  }
   0xa   :  { %263 = vsyncadd [#allocation5], 4294967040 }
   0xb   :  { %37 = sfence }
   0xc   :  { %v38_v0 = vld [vmem:[#allocation7] sm:$0xff]  ;;  %v39_v1 = vld [vmem:[#allocation7 + $0x8] sm:$0xff]  ;;  %v266_v3 = vmov 0   ;;  %vm48_vm0 = vcmask 7168   ;;  %v267_v7 = vmov 0.0   ;;  %s207_s0 = sld [smem:[#allocation4 + $0x1]] }
   0xd   :  { %v44_v2 = vadd.f32 %v39_v1, %v38_v0  ;;  %217 = vset.pattern.permute.xlu0 %v266_v3  ;;  %50 = vst.msk [vmem:[#allocation2] sm:$0xff] %vm48_vm0, %v267_v7  ;;  %s268_s1 = smov 1   ;;  %s208_s18 = sld [smem:[#allocation4 + $0x2]]  ;;  %vm195_vm11 = vcmask 15360   ;;  %vm197_vm12 = vcmask 23552   ;;  %vm199_vm13 = vcmask 31744  }
   0xe   :  { %51 = vst.msk [vmem:[#allocation2 + $0x8] sm:$0xff] %vm48_vm0, %v267_v7  ;;  %s209_s19 = sld [smem:[#allocation4 + $0x3]]  ;;  %s269_s20 = smov 2  }
   0xf   :  { %45 = vadd.xlane.f32.xlu0 %v44_v2  ;;  %52 = vst.msk [vmem:[#allocation2 + $0x10] sm:$0xff] %vm48_vm0, %v267_v7  ;;  %s270_s21 = smov 3   ;;  %s170_s22 = sld [smem:[#allocation4]] }
  0x10   :  { %53 = vst.msk [vmem:[#allocation2 + $0x18] sm:$0xff] %vm48_vm0, %v267_v7 }
  0x12   :  { %v174_v38 = vstv %s207_s0 }
  0x14   :  { %v64_v21 = vld [vmem:[#allocation2] sm:$0xff] }
  0x15   :  { %v72_v27 = vld [vmem:[#allocation2 + $0x8] sm:$0xff] }
  0x16   :  { %v79_v24 = vld [vmem:[#allocation2 + $0x10] sm:$0xff] }
  0x17   :  { %v88_v30 = vld [vmem:[#allocation2 + $0x18] sm:$0xff] }
  0x82   :  { %v46_v4 = vpop.xlane.xlu0 %45 }
  0x83   :  { %v47_v5 = vmul.f32 0.00390625, %v46_v4 }
  0x85   :  { %49 = vst.msk [vmem:[#allocation3] sm:$0xff] %vm48_vm0, %v47_v5 }
  0x8c   :  { %v293_v6 = vld [vmem:[#allocation3] sm:$0xff] }
  0x8d   :  { %57 = vperm.xlu0 %217, %v293_v6  }
  0xff   :  { %v58_v8 = vpop.permute.xlu0 %57 }
 0x100   :  { %v60_v9 = vsub.f32 %v38_v0, %v58_v8  ;;  %v61_v10 = vsub.f32 %v39_v1, %v58_v8 }
 0x102   :  { %v62_v11 = vmul.f32 %v60_v9, %v60_v9  ;;  %v63_v12 = vmul.f32 %v61_v10, %v61_v10  ;;  %v65_v13 = vadd.f32 %v61_v10, %v60_v9 }
 0x104   :  { %66 = vadd.xlane.f32.xlu1 %v65_v13  ;;  %v80_v14 = vmul.f32 %v62_v11, %v60_v9  ;;  %v81_v15 = vmul.f32 %v63_v12, %v61_v10  ;;  %v73_v17 = vadd.f32 %v63_v12, %v62_v11  ;;  %v89_v18 = vmul.f32 %v62_v11, %v62_v11 }
 0x105   :  { %v90_v19 = vmul.f32 %v63_v12, %v63_v12 }
 0x106   :  { %v82_v16 = vadd.f32 %v81_v15, %v80_v14 }
 0x107   :  { %v91_v20 = vadd.f32 %v90_v19, %v89_v18 }
 0x108   :  { %83 = vadd.xlane.f32.xlu2 %v82_v16 }
 0x10c   :  { %74 = vadd.xlane.f32.xlu1 %v73_v17 }
 0x110   :  { %92 = vadd.xlane.f32.xlu2 %v91_v20 }
 0x177   :  { %v67_v22 = vpop.xlane.xlu1 %66 }
 0x178   :  { %v68_v23 = vadd.f32 %v67_v22, %v64_v21 }
 0x17a   :  { %70 = vst.msk [vmem:[#allocation2] sm:$0xff] %vm48_vm0, %v68_v23 }
 0x17b   :  { %v84_v25 = vpop.xlane.xlu2 %83 }
 0x17c   :  { %v85_v26 = vadd.f32 %v84_v25, %v79_v24 }
 0x17e   :  { %86 = vst.msk [vmem:[#allocation2 + $0x10] sm:$0xff] %vm48_vm0, %v85_v26  ;;  %v177_v26 = vstv %s208_s18 }
 0x17f   :  { %v75_v28 = vpop.xlane.xlu1 %74 }
 0x180   :  { %v76_v29 = vadd.f32 %v75_v28, %v72_v27 }
 0x181   :  { %v99_v31 = vld [vmem:[#allocation2] sm:$0xff] }
 0x182   :  { %77 = vst.msk [vmem:[#allocation2 + $0x8] sm:$0xff] %vm48_vm0, %v76_v29  ;;  %v303_v34 = vmul.f32 0.00390625, %v99_v31 }
 0x183   :  { %v93_v32 = vpop.xlane.xlu2 %92 }
 0x184   :  { %v94_v33 = vadd.f32 %v93_v32, %v88_v30  ;;  %v109_v36 = vmul.f32 %v303_v34, %v303_v34  ;;  %v119_v49 = vmul.f32 3.0, %v303_v34  ;;  %v112_v55 = vmul.f32 2.0, %v303_v34 }
 0x185   :  { %v103_v58 = vld [vmem:[#allocation2 + $0x10] sm:$0xff]  ;;  %v180_v32 = vstv %s209_s19 }
 0x186   :  { %95 = vst.msk [vmem:[#allocation2 + $0x18] sm:$0xff] %vm48_vm0, %v94_v33  ;;  %v120_v57 = vmul.f32 %v119_v49, %v303_v34  ;;  %v104_v62 = vmul.f32 0.00390625, %v103_v58  ;;  %v113_v63 = vmul.f32 %v112_v55, %v303_v34 }
 0x188   :  { %v117_v4 = vmul.f32 4.0, %v104_v62 }
 0x189   :  { %v101_v35 = vld [vmem:[#allocation2 + $0x8] sm:$0xff] }
 0x18a   :  { %v102_v37 = vmul.f32 0.00390625, %v101_v35 }
 0x18c   :  { %v110_v39 = vsub.f32 %v102_v37, %v109_v36  ;;  %v118_v53 = vmul.f32 6.0, %v102_v37  ;;  %v111_v59 = vmul.f32 3.0, %v102_v37  ;;  %v108_v36 = vadd.f32 %v303_v34, %v293_v6 }
 0x18d   :  { %v105_v17 = vld [vmem:[#allocation2 + $0x18] sm:$0xff]  ;;  %v171_v37 = vstv %s170_s22 }
 0x18e   :  { %v175_v40 = vmul.f32 %v174_v38, %v110_v39  ;;  %218 = vrsqrt.f32 %v110_v39  ;;  %v137_v52 = vand.u32 2147483648, %v110_v39  ;;  %vm147_vm1 = vcmp.eq.f32.partialorder %v110_v39, inf }
 0x18f   :  { %220 = vrcp.f32 %v110_v39  ;;  %vm149_vm2 = vcmp.eq.f32.partialorder %v110_v39, 0.0  ;;  %v121_v61 = vsub.f32 %v118_v53, %v120_v57  ;;  %v114_v0 = vsub.f32 %v111_v59, %v113_v63 }
 0x190   :  { %183 = vrot.lane.b32.xlu1 %v175_v40, %s268_s1  ;;  %vm131_vm4 = vweird.f32 %v110_v39  ;;  %v135_v5 = vand.u32 2147483647, %v110_v39  ;;  %v138_v12 = vor.u32 1.1754944e-38, %v137_v52  ;;  %v106_v24 = vmul.f32 0.00390625, %v105_v17 }
 0x191   :  { %v122_v2 = vmul.f32 %v121_v61, %v303_v34  ;;  %v115_v8 = vmul.f32 %v114_v0, %v303_v34 }
 0x192   :  { %vm136_vm6 = vcmp.eq.f32.partialorder %v135_v5, 8.507059e+37 }
 0x193   :  { %v123_v11 = vsub.f32 %v117_v4, %v122_v2  ;;  %v116_v18 = vsub.f32 %v104_v62, %v115_v8 }
 0x194   :  { %v219_v41 = vpop.eup %218 }
 0x195   :  { %v141_v42 = vmul.f32 %v219_v41, %v110_v39  ;;  %v221_v44 = vpop.eup %220  ;;  %v124_v20 = vmul.f32 %v123_v11, %v303_v34 }
 0x196   :  { %v127_v47 = vmul.f32 %v221_v44, %v110_v39  ;;  %vm132_vm3 = vweird.f32 %v221_v44 }
 0x197   :  { %v142_v43 = vmul.f32 %v219_v41, %v141_v42  ;;  %vm133_vm5 = vmor %vm131_vm4, %vm132_vm3  ;;  %v125_v28 = vsub.f32 %v106_v24, %v124_v20 }
 0x198   :  { %v128_v51 = vsub.f32 1.0, %v127_v47 }
 0x199   :  { %v143_v45 = vmul.f32 0.5, %v142_v43 }
 0x19a   :  { %v129_v60 = vmul.f32 %v221_v44, %v128_v51 }
 0x19b   :  { %v144_v46 = vsub.f32 1.5, %v143_v45 }
 0x19c   :  { %v130_v1 = vadd.f32 %v221_v44, %v129_v60 }
 0x19d   :  { %v145_v48 = vmul.f32 %v219_v41, %v144_v46 }
 0x19e   :  { %v134_v9 = vsel %vm133_vm5, %v221_v44, %v130_v1 }
 0x19f   :  { %v146_v50 = vmul.f32 %v145_v48, %v110_v39  ;;  %v139_v16 = vsel %vm136_vm6, %v138_v12, %v134_v9 }
 0x1a0   :  { %v166_v23 = vmul.f32 %v139_v16, %v116_v18  ;;  %v168_v30 = vmul.f32 %v139_v16, %v125_v28 }
 0x1a1   :  { %v148_v54 = vsel %vm147_vm1, %v110_v39, %v146_v50  ;;  %v172_v39 = vmul.f32 %v171_v37, %v108_v36 }
 0x1a2   :  { %v151_v56 = vsel %vm149_vm2, %v137_v52, %v148_v54  ;;  %v169_v31 = vmul.f32 %v168_v30, %v139_v16 }
 0x1a3   :  { %222 = vrcp.f32 %v151_v56  ;;  %v163_v13 = vand.u32 2147483648, %v151_v56  ;;  %v161_v15 = vand.u32 2147483647, %v151_v56  ;;  %vm157_vm8 = vweird.f32 %v151_v56 }
 0x1a4   :  { %v181_v33 = vmul.f32 %v180_v32, %v169_v31 }
 0x1a5   :  { %v164_v21 = vor.u32 1.1754944e-38, %v163_v13  ;;  %vm162_vm10 = vcmp.eq.f32.partialorder %v161_v15, 8.507059e+37 }
 0x1a9   :  { %v223_v3 = vpop.eup %222 }
 0x1aa   :  { %v153_v7 = vmul.f32 %v223_v3, %v151_v56  ;;  %vm158_vm7 = vweird.f32 %v223_v3 }
 0x1ab   :  { %vm159_vm9 = vmor %vm157_vm8, %vm158_vm7 }
 0x1ac   :  { %v154_v10 = vsub.f32 1.0, %v153_v7 }
 0x1ae   :  { %v155_v14 = vmul.f32 %v223_v3, %v154_v10 }
 0x1b0   :  { %v156_v19 = vadd.f32 %v223_v3, %v155_v14 }
 0x1b2   :  { %v160_v22 = vsel %vm159_vm9, %v223_v3, %v156_v19 }
 0x1b3   :  { %v165_v25 = vsel %vm162_vm10, %v164_v21, %v160_v22 }
 0x1b4   :  { %v167_v27 = vmul.f32 %v166_v23, %v165_v25 }
 0x1b6   :  { %v178_v29 = vmul.f32 %v177_v26, %v167_v27 }
 0x1b8   :  { %187 = vrot.lane.b32.xlu2 %v178_v29, %s269_s20 }
 0x1c0   :  { %191 = vrot.lane.b32.xlu2 %v181_v33, %s270_s21 }
 0x202   :  { %v184_v38 = vpop.permute.xlu1 %183 }
 0x203   :  { %v194_v40 = vsel %vm48_vm0, %v172_v39, %v184_v38 }
 0x212   :  { %v188_v35 = vpop.permute.xlu2 %187 }
 0x213   :  { %v196_v41 = vsel %vm195_vm11, %v194_v40, %v188_v35 }
 0x21a   :  { %v192_v42 = vpop.permute.xlu2 %191 }
 0x21b   :  { %v198_v43 = vsel %vm197_vm12, %v196_v41, %v192_v42 }
 0x21c   :  { %200 = vst.msk [vmem:[%s323_s2] sm:$0xff] %vm199_vm13, %v198_v43 }
 0x21d   :  { %205 = vsyncpa [#allocation5], 1 }
 0x21e   :  { %206 = vsyncpa [#allocation6], 1 }

</bundles_post_ra>
